<compile_context>
chip_gen: v5e
topology: v5e:2x2
jax: 0.10.0
libtpu: 0.0.40
codegen_flags: <defaults>
</compile_context>

<pallas_src>
import functools

import jax
import jax.numpy as jnp
from jax.experimental import pallas as pl
from jax.experimental.pallas import tpu as pltpu


def _round_up(n, m):
    return ((n + m - 1) // m) * m


def _lorentz_relu_kernel(x_ref, o_ref, *, k_inv, d):
    # x_ref / o_ref: (D, TN) blocks; row 0 = time, rows 1..D-1 = space.
    x = x_ref[...]
    if x.dtype != jnp.float32:
        x = x.astype(jnp.float32)                # f32 accumulation for bf16 input
    space = jnp.maximum(x, 0.0)                  # ReLU whole block (VPU); row 0 unused

    # Statically unrolled sum of squares over the D-1 space rows (VPU only).
    row = space[1:2, :]
    sq = row * row
    for i in range(2, d):
        row = space[i:i + 1, :]
        sq = sq + row * row

    time = jnp.sqrt(sq + k_inv)                  # EUP

    o_ref[0:1, :] = time.astype(o_ref.dtype)
    o_ref[1:, :] = space[1:, :].astype(o_ref.dtype)


def group_lorentz_relu(x, k: float = 1.0, block_cols: int = 64 * 1024):
    """Pallas implementation of GroupLorentzReLU.forward (add_time=True)."""
    orig_shape = x.shape
    D = orig_shape[-1]
    if D < 2:
        raise ValueError("Lorentz dim must have at least one space component")

    # Lane-dense slab: (N, D) -> (D, N) so N maps onto the 128-wide lane axis.
    xt = x.reshape(-1, D).T
    N = xt.shape[1]

    # Keep double-buffered (in + out) f32-equivalent tiles under ~16 MB VMEM.
    itemsize = max(jnp.dtype(x.dtype).itemsize, 4)
    vmem_budget = 16 * 1024 * 1024
    bc_cap = max(128, (vmem_budget // (4 * D * itemsize)) // 128 * 128)

    bc = min(block_cols, bc_cap, _round_up(N, 128))   # lane-aligned tile width
    grid = (pl.cdiv(N, bc),)                          # edge block clipped by Pallas

    out_t = pl.pallas_call(
        functools.partial(_lorentz_relu_kernel, k_inv=1.0 / float(k), d=D),
        out_shape=jax.ShapeDtypeStruct((D, N), x.dtype),
        grid=grid,
        in_specs=[pl.BlockSpec((D, bc), lambda i: (0, i))],
        out_specs=pl.BlockSpec((D, bc), lambda i: (0, i)),
        compiler_params=pltpu.CompilerParams(
            dimension_semantics=("parallel",)),
    )(xt)

    return out_t.T.reshape(orig_shape)


def _reference(x, k: float = 1.0):
    space = jnp.maximum(x[..., 1:], 0.0)
    time = jnp.sqrt(jnp.sum(space * space, axis=-1, keepdims=True) + 1.0 / k)
    return jnp.concatenate([time, space], axis=-1)


if __name__ == "__main__":
    key = jax.random.PRNGKey(0)

    # Small shape consistent with the module: batch=2, spatial=16x16,
    # 4 space channels + 1 time component => C = 5 (channels-last Lorentz dim).
    x = jax.random.normal(key, (2, 16, 16, 5), dtype=jnp.float32)
    out = jax.block_until_ready(group_lorentz_relu(x, k=1.0))
    ref = _reference(x, k=1.0)
    assert out.shape == x.shape and out.dtype == x.dtype
    assert jnp.allclose(out, ref, atol=1e-5, rtol=1e-5), "mismatch vs reference"

    # Ragged-edge check: flattened N not a multiple of 128, and k != 1.
    x2 = jax.random.normal(jax.random.PRNGKey(1), (3, 7, 11, 5), dtype=jnp.float32)
    out2 = jax.block_until_ready(group_lorentz_relu(x2, k=0.5))
    ref2 = _reference(x2, k=0.5)
    assert jnp.allclose(out2, ref2, atol=1e-5, rtol=1e-5), "mismatch vs reference (ragged)"

    print("KERNEL_OK")
</pallas_src>

<mosaic_0001>
module attributes {stable_mosaic.version = 11 : i64} {
  func.func @_lorentz_relu_kernel(%arg0: i32, %arg1: memref<5x512xf32, #tpu.memory_space<vmem>>, %arg2: memref<5x512xf32, #tpu.memory_space<vmem>>) attributes {dimension_semantics = [#tpu.dimension_semantics<parallel>], iteration_bounds = array<i64: 1>, scalar_prefetch = 0 : i64, scratch_operands = 0 : i64, tpu.core_type = #tpu.core_type<tc>, window_params = [{transform_indices = @transform_0, window_bounds = array<i64: 5, 512>}, {transform_indices = @transform_1, window_bounds = array<i64: 5, 512>}]} {
    %c0 = arith.constant 0 : index
    %c0_0 = arith.constant 0 : index
    %0 = vector.load %arg1[%c0, %c0_0] : memref<5x512xf32, #tpu.memory_space<vmem>>, vector<5x512xf32>
    %cst = arith.constant 0.000000e+00 : f32
    %1 = vector.broadcast %cst : f32 to vector<5x512xf32>
    %2 = arith.maximumf %0, %1 : vector<5x512xf32>
    %3 = vector.extract_strided_slice %2 {offsets = [1, 0], sizes = [1, 512], strides = [1, 1]} : vector<5x512xf32> to vector<1x512xf32>
    %4 = arith.mulf %3, %3 : vector<1x512xf32>
    %5 = vector.extract_strided_slice %2 {offsets = [2, 0], sizes = [1, 512], strides = [1, 1]} : vector<5x512xf32> to vector<1x512xf32>
    %6 = arith.mulf %5, %5 : vector<1x512xf32>
    %7 = arith.addf %4, %6 : vector<1x512xf32>
    %8 = vector.extract_strided_slice %2 {offsets = [3, 0], sizes = [1, 512], strides = [1, 1]} : vector<5x512xf32> to vector<1x512xf32>
    %9 = arith.mulf %8, %8 : vector<1x512xf32>
    %10 = arith.addf %7, %9 : vector<1x512xf32>
    %11 = vector.extract_strided_slice %2 {offsets = [4, 0], sizes = [1, 512], strides = [1, 1]} : vector<5x512xf32> to vector<1x512xf32>
    %12 = arith.mulf %11, %11 : vector<1x512xf32>
    %13 = arith.addf %10, %12 : vector<1x512xf32>
    %cst_1 = arith.constant 1.000000e+00 : f32
    %14 = vector.broadcast %cst_1 : f32 to vector<1x512xf32>
    %15 = arith.addf %13, %14 : vector<1x512xf32>
    %16 = math.sqrt %15 : vector<1x512xf32>
    %c0_2 = arith.constant 0 : index
    %c0_3 = arith.constant 0 : index
    %17 = vector.load %arg2[%c0_2, %c0_3] : memref<5x512xf32, #tpu.memory_space<vmem>>, vector<1x512xf32>
    tpu.vector_store %arg2[%c0_2, %c0_3], %16 {strides = array<i32>} : memref<5x512xf32, #tpu.memory_space<vmem>>, vector<1x512xf32>,
    %18 = vector.extract_strided_slice %2 {offsets = [1, 0], sizes = [4, 512], strides = [1, 1]} : vector<5x512xf32> to vector<4x512xf32>
    %c1 = arith.constant 1 : index
    %c0_4 = arith.constant 0 : index
    %19 = vector.load %arg2[%c1, %c0_4] : memref<5x512xf32, #tpu.memory_space<vmem>>, vector<4x512xf32>
    tpu.vector_store %arg2[%c1, %c0_4], %18 {strides = array<i32>} : memref<5x512xf32, #tpu.memory_space<vmem>>, vector<4x512xf32>,
    return
  }
  func.func @transform_0(%arg0: i32) -> (i32, i32) {
    %c0_i32 = arith.constant 0 : i32
    %c0_i32_0 = arith.constant 0 : i32
    return %c0_i32, %arg0 : i32, i32
  }
  func.func @transform_1(%arg0: i32) -> (i32, i32) {
    %c0_i32 = arith.constant 0 : i32
    %c0_i32_0 = arith.constant 0 : i32
    return %c0_i32, %arg0 : i32, i32
  }
}

</mosaic_0001>

<bundles_post_ra>
// kernel: tpu_custom_call.1
= control target key start
LH: loop header
LB: loop body
LE: loop exit
PB: predicated region body
PF: predicated region fallthrough
CT: control target
= control target key end

     0   :  { %6 = vsyncpa [#allocation3], 0  ;;  %s246_s0 = inlined_call_operand.hbm [shape: f32[5,512], index: 0, kind: input, shape index: {}]   ;;  %s247_s1 = inlined_call_operand.hbm [shape: f32[5,512], index: 1, kind: output, shape index: {}]  }
   0x1   :  { %7 = vsyncpa [#allocation4], 0  ;;  %s13_s8 = sshll.u32 %s246_s0, 4  ;;  %s227_s9 = smov [#allocation2]   ;;  %s14_s8 = int_to_ptr.hbm [resolvable:$true] %s13_s8 }
   0x2   :  { %s15_s10 = sshll.u32 %s227_s9, 4  ;;  %s16_s10 = int_to_ptr.vmem [resolvable:$true] %s15_s10 }
   0x3   :  { %18 = dma.hbm_to_vmem [thread:$0]  %s14_s8, 512, %s16_s10, [#allocation3]  }
   0x4   :  { %223 = dma.done.wait [#allocation3], 512  }
   0x5   :  { %224 = vsyncadd [#allocation3], 4294966784  ;;  %v23_v0 = vld [vmem:[#allocation2] sm:$0x1f]  ;;  %v24_v1 = vld [vmem:[#allocation2 + $0x8] sm:$0x1f] }
   0x6   :  { %v25_v2 = vld [vmem:[#allocation2 + $0x10] sm:$0x1f]  ;;  %v27_v3 = vmax.f32 %v23_v0, 0.0  ;;  %v28_v4 = vmax.f32 %v24_v1, 0.0  ;;  %v26_v6 = vld [vmem:[#allocation2 + $0x18] sm:$0x1f] }
   0x7   :  { %v29_v5 = vmax.f32 %v25_v2, 0.0  ;;  %v30_v7 = vmax.f32 %v26_v6, 0.0  ;;  %s228_s0 = smov [#allocation5]   ;;  %s155_s14 = sshll.u32 %s247_s1, 4  ;;  %s156_s14 = int_to_ptr.hbm [resolvable:$true] %s155_s14 }
   0x8   :  { %v31_v8 = vmul.f32 %v27_v3, %v27_v3  ;;  %144 = vst [vmem:[#allocation5] sm:$0x1e] %v27_v3  ;;  %v32_v9 = vmul.f32 %v28_v4, %v28_v4  ;;  %s153_s11 = sshll.u32 %s228_s0, 4  ;;  %s154_s11 = int_to_ptr.vmem [resolvable:$true] %s153_s11 }
   0x9   :  { %v33_v10 = vmul.f32 %v29_v5, %v29_v5  ;;  %145 = vst [vmem:[#allocation5 + $0x8] sm:$0x1e] %v28_v4  ;;  %v34_v11 = vmul.f32 %v30_v7, %v30_v7 }
   0xa   :  { %v39_v12 = vrot.slane %v31_v8, 1  ;;  %v51_v13 = vrot.slane %v31_v8, 2  ;;  %v40_v14 = vrot.slane %v32_v9, 1  ;;  %146 = vst [vmem:[#allocation5 + $0x10] sm:$0x1e] %v29_v5  ;;  %v63_v15 = vrot.slane %v31_v8, 3 }
   0xb   :  { %v52_v16 = vrot.slane %v32_v9, 2  ;;  %v41_v17 = vrot.slane %v33_v10, 1  ;;  %v53_v18 = vrot.slane %v33_v10, 2  ;;  %147 = vst [vmem:[#allocation5 + $0x18] sm:$0x1e] %v30_v7  ;;  %v64_v21 = vrot.slane %v32_v9, 3 }
   0xc   :  { %v47_v19 = vadd.f32 %v39_v12, %v31_v8  ;;  %v48_v20 = vadd.f32 %v40_v14, %v32_v9  ;;  %v42_v22 = vrot.slane %v34_v11, 1  ;;  %v65_v24 = vrot.slane %v33_v10, 3 }
   0xd   :  { %v49_v23 = vadd.f32 %v41_v17, %v33_v10  ;;  %v54_v25 = vrot.slane %v34_v11, 2  ;;  %v66_v30 = vrot.slane %v34_v11, 3 }
   0xe   :  { %v59_v26 = vadd.f32 %v51_v13, %v47_v19  ;;  %v60_v27 = vadd.f32 %v52_v16, %v48_v20  ;;  %v50_v28 = vadd.f32 %v42_v22, %v34_v11  ;;  %v138_v16 = vlaneseq }
   0xf   :  { %v61_v29 = vadd.f32 %v53_v18, %v49_v23 }
  0x10   :  { %v71_v31 = vadd.f32 %v63_v15, %v59_v26  ;;  %v72_v32 = vadd.f32 %v64_v21, %v60_v27  ;;  %v62_v33 = vadd.f32 %v54_v25, %v50_v28  ;;  %vm140_vm8 = vcmp.lt.s32.totalorder %v138_v16, 512 }
  0x11   :  { %v73_v34 = vadd.f32 %v65_v24, %v61_v29 }
  0x12   :  { %v75_v35 = vadd.f32 1.0, %v71_v31  ;;  %v76_v36 = vadd.f32 1.0, %v72_v32  ;;  %v74_v38 = vadd.f32 %v66_v30, %v62_v33 }
  0x13   :  { %v77_v37 = vadd.f32 1.0, %v73_v34 }
  0x14   :  { %167 = vrsqrt.f32 %v75_v35  ;;  %v78_v39 = vadd.f32 1.0, %v74_v38  ;;  %vm86_vm0 = vcmp.eq.f32.partialorder %v75_v35, inf  ;;  %vm88_vm1 = vcmp.eq.f32.partialorder %v75_v35, 0.0 }
  0x15   :  { %169 = vrsqrt.f32 %v76_v36  ;;  %v89_v59 = vand.u32 2147483648, %v75_v35  ;;  %vm98_vm2 = vcmp.eq.f32.partialorder %v76_v36, inf  ;;  %vm100_vm3 = vcmp.eq.f32.partialorder %v76_v36, 0.0 }
  0x16   :  { %171 = vrsqrt.f32 %v77_v37  ;;  %v101_v63 = vand.u32 2147483648, %v76_v36  ;;  %vm110_vm4 = vcmp.eq.f32.partialorder %v77_v37, inf  ;;  %v113_v2 = vand.u32 2147483648, %v77_v37 }
  0x17   :  { %173 = vrsqrt.f32 %v78_v39  ;;  %vm112_vm5 = vcmp.eq.f32.partialorder %v77_v37, 0.0  ;;  %vm122_vm6 = vcmp.eq.f32.partialorder %v78_v39, inf  ;;  %v125_v11 = vand.u32 2147483648, %v78_v39 }
  0x18   :  { %vm124_vm7 = vcmp.eq.f32.partialorder %v78_v39, 0.0 }
  0x1a   :  { %v168_v40 = vpop.eup %167 }
  0x1b   :  { %v170_v41 = vpop.eup %169  ;;  %v80_v42 = vmul.f32 %v168_v40, %v75_v35 }
  0x1c   :  { %v172_v43 = vpop.eup %171  ;;  %v92_v44 = vmul.f32 %v170_v41, %v76_v36 }
  0x1d   :  { %v81_v45 = vmul.f32 %v168_v40, %v80_v42  ;;  %v104_v46 = vmul.f32 %v172_v43, %v77_v37  ;;  %v174_v48 = vpop.eup %173 }
  0x1e   :  { %v93_v47 = vmul.f32 %v170_v41, %v92_v44  ;;  %v116_v52 = vmul.f32 %v174_v48, %v78_v39 }
  0x1f   :  { %v82_v49 = vmul.f32 0.5, %v81_v45  ;;  %v105_v50 = vmul.f32 %v172_v43, %v104_v46 }
  0x20   :  { %v94_v51 = vmul.f32 0.5, %v93_v47  ;;  %v117_v56 = vmul.f32 %v174_v48, %v116_v52 }
  0x21   :  { %v83_v53 = vsub.f32 1.5, %v82_v49  ;;  %v106_v54 = vmul.f32 0.5, %v105_v50 }
  0x22   :  { %v95_v55 = vsub.f32 1.5, %v94_v51  ;;  %v118_v61 = vmul.f32 0.5, %v117_v56 }
  0x23   :  { %v84_v57 = vmul.f32 %v168_v40, %v83_v53  ;;  %v107_v58 = vsub.f32 1.5, %v106_v54 }
  0x24   :  { %v96_v60 = vmul.f32 %v170_v41, %v95_v55  ;;  %v119_v3 = vsub.f32 1.5, %v118_v61 }
  0x25   :  { %v85_v62 = vmul.f32 %v84_v57, %v75_v35  ;;  %v108_v0 = vmul.f32 %v172_v43, %v107_v58 }
  0x26   :  { %v97_v1 = vmul.f32 %v96_v60, %v76_v36  ;;  %v120_v8 = vmul.f32 %v174_v48, %v119_v3 }
  0x27   :  { %v87_v4 = vsel %vm86_vm0, %v75_v35, %v85_v62  ;;  %v109_v5 = vmul.f32 %v108_v0, %v77_v37 }
  0x28   :  { %v90_v6 = vsel %vm88_vm1, %v89_v59, %v87_v4  ;;  %v99_v7 = vsel %vm98_vm2, %v76_v36, %v97_v1  ;;  %v121_v13 = vmul.f32 %v120_v8, %v78_v39 }
  0x29   :  { %131 = vst [vmem:[#allocation1] sm:$0xff] %v90_v6  ;;  %v102_v9 = vsel %vm100_vm3, %v101_v63, %v99_v7  ;;  %v111_v10 = vsel %vm110_vm4, %v77_v37, %v109_v5 }
  0x2a   :  { %132 = vst [vmem:[#allocation1 + $0x9] sm:$0xff] %v102_v9  ;;  %v114_v12 = vsel %vm112_vm5, %v113_v2, %v111_v10  ;;  %v123_v14 = vsel %vm122_vm6, %v78_v39, %v121_v13 }
  0x2b   :  { %133 = vst [vmem:[#allocation1 + $0x12] sm:$0xff] %v114_v12  ;;  %v126_v15 = vsel %vm124_vm7, %v125_v11, %v123_v14 }
  0x2c   :  { %134 = vst [vmem:[#allocation1 + $0x1b] sm:$0xff] %v126_v15 }
  0x33   :  { %v136_v17 = vld [vmem:[#allocation1 + $0x1] ss:$9 sm:$0xff] }
  0x34   :  { %142 = vst.msk [vmem:[#allocation5] ss:$8 sm:$0xf] %vm140_vm8, %v136_v17 }
  0x35   :  { %158 = dma.vmem_to_hbm [thread:$0]  %s154_s11, 512, %s156_s14, [#allocation4]  }
  0x36   :  { %225 = dma.done.wait [#allocation4], 512  }
  0x37   :  { %226 = vsyncadd [#allocation4], 4294966784 }
  0x38   :  { %163 = vsyncpa [#allocation3], 1 }
  0x39   :  { %164 = vsyncpa [#allocation4], 1 }

</bundles_post_ra>
